<compile_context>
chip_gen: v7x
topology: tpu7x:2x2x1
jax: 0.10.0
libtpu: 0.0.40
codegen_flags: <defaults>
</compile_context>

<pallas_src>
import jax
import jax.numpy as jnp
from jax import lax
from jax.experimental import pallas as pl
from jax.experimental.pallas import tpu as pltpu


def _patch_embed_kernel(x_ref, w_ref, b_ref, o_ref, col_ref):
    """One band of r patch-rows of one image: im2col in VMEM + single matmul.

    x_ref  : (1, C, r, P, Wp, P)  activations band (input dtype, f32)
    w_ref  : (K, E)  bf16 matmul weight (K = C*P*P), resident across steps
    b_ref  : (1, E)  f32 bias
    o_ref  : (1, r*Wp, E) output block
    col_ref: (r*Wp, K) VMEM scratch -- the im2col tile
    """
    _, C, r, P, Wp, _ = x_ref.shape
    # Build the im2col tile with fully static slab copies (layout-only VMEM
    # work that hides under the next block's DMA).  K is flattened (c, kh, kw)
    # to match prepare_proj_weight.
    for c in range(C):
        for hr in range(r):
            row = hr * Wp
            for kh in range(P):
                col = (c * P + kh) * P
                col_ref[row:row + Wp, col:col + P] = x_ref[0, c, hr, kh]
    # One MXU matmul per grid step: bf16 inputs, f32 accumulation.
    y = jnp.dot(col_ref[...].astype(jnp.bfloat16), w_ref[...],
                preferred_element_type=jnp.float32)
    o_ref[0] = (y + b_ref[...]).astype(o_ref.dtype)


def prepare_proj_weight(conv_w):
    """Conv weight (E, C, P, P) -> bf16 matmul weight (C*P*P, E).  Call once
    (weights are static across forward calls)."""
    E = conv_w.shape[0]
    return conv_w.reshape(E, -1).T.astype(jnp.bfloat16)


def _pick_rows_per_step(Hp, Wp, max_m=256):
    """Patch rows per grid step: divisor of Hp, M = r*Wp <= max_m (v7x VMEM),
    prefer M % 8 == 0 and >= 2 steps along the row axis (pipelining)."""
    best = 1
    for r in range(1, Hp + 1):
        if Hp % r != 0 or r * Wp > max_m:
            continue
        if Hp // r < 2 and Hp > 1:
            continue
        if ((r * Wp) % 8 == 0, r) > ((best * Wp) % 8 == 0, best):
            best = r
    return best


def img_to_patch_forward(x, w_mat, conv_b, patch_size):
    """x: (B,C,H,W); w_mat: (C*P*P, E) bf16 from prepare_proj_weight;
    conv_b: (E,).  Returns (B, n_patches, E) in x.dtype."""
    B, C, H, W = x.shape
    P = patch_size
    assert H % P == 0 and W % P == 0, "image size must be divisible by patch"
    Hp, Wp = H // P, W // P
    Np = Hp * Wp
    K, E = w_mat.shape
    assert K == C * P * P

    r = _pick_rows_per_step(Hp, Wp)
    tm = r * Wp                      # patches (output rows) per grid step

    # Metadata-only reshape (no HBM copy): H -> (Hp, P), W -> (Wp, P).
    x6 = x.reshape(B, C, Hp, P, Wp, P)
    bias2d = conv_b.reshape(1, E).astype(jnp.float32)

    flops = 2 * B * Np * K * E
    bytes_accessed = (x.size * x.dtype.itemsize + w_mat.size * 2 + E * 4
                      + B * Np * E * x.dtype.itemsize)

    return pl.pallas_call(
        _patch_embed_kernel,
        out_shape=jax.ShapeDtypeStruct((B, Np, E), x.dtype),
        grid_spec=pltpu.PrefetchScalarGridSpec(
            num_scalar_prefetch=0,
            grid=(B, Hp // r),
            in_specs=[
                pl.BlockSpec((1, C, r, P, Wp, P),
                             lambda b, h: (b, 0, h, 0, 0, 0)),
                pl.BlockSpec((K, E), lambda b, h: (0, 0)),
                pl.BlockSpec((1, E), lambda b, h: (0, 0)),
            ],
            out_specs=pl.BlockSpec((1, tm, E), lambda b, h: (b, h, 0)),
            scratch_shapes=[pltpu.VMEM((tm, K), x.dtype)],
        ),
        compiler_params=pltpu.CompilerParams(
            dimension_semantics=("parallel", "parallel")),
        cost_estimate=pl.CostEstimate(flops=flops, transcendentals=0,
                                      bytes_accessed=bytes_accessed),
    )(x6, w_mat, bias2d)


def init_params(key, input_ch, embed_size, patch_size):
    kw, kb = jax.random.split(key)
    s = 0.02
    conv_w = s * jax.random.normal(
        kw, (embed_size, input_ch, patch_size, patch_size), jnp.float32)
    conv_b = s * jax.random.normal(kb, (embed_size,), jnp.float32)
    return conv_w, conv_b


if __name__ == "__main__":
    # Small shapes consistent with the module: batch=2, channels=4,
    # spatial 16x16, patch=4 -> n_patches=16, embed=32.
    B, C, H, W = 2, 4, 16, 16
    P = 4
    E = 32

    key = jax.random.PRNGKey(0)
    kx, kp = jax.random.split(key)
    x = jax.random.normal(kx, (B, C, H, W), jnp.float32)
    conv_w, conv_b = init_params(kp, C, E, P)

    # One-time weight prep (hoisted out of the per-forward path).
    w_mat = prepare_proj_weight(conv_w)

    out = img_to_patch_forward(x, w_mat, conv_b, P)
    out = jax.block_until_ready(out)

    Hp, Wp = H // P, W // P
    Np = Hp * Wp
    K = C * P * P
    assert out.shape == (B, Np, E)

    # Reference 1: same arithmetic path as the kernel (bf16 inputs, f32
    # accumulation) -> tight tolerance.
    patches = (x.reshape(B, C, Hp, P, Wp, P)
                 .transpose(0, 2, 4, 1, 3, 5)
                 .reshape(B, Np, K))
    ref_bf16 = jnp.einsum("bnk,ke->bne", patches.astype(jnp.bfloat16), w_mat,
                          preferred_element_type=jnp.float32)
    ref_bf16 = ref_bf16 + conv_b[None, None, :]
    assert jnp.allclose(out, ref_bf16, atol=1e-4, rtol=1e-4)

    # Reference 2: original module semantics (full-precision strided conv)
    # -> tolerance loosened to cover the bf16 cast of the matmul inputs.
    y = lax.conv_general_dilated(
        x, conv_w, window_strides=(P, P), padding="VALID",
        dimension_numbers=("NCHW", "OIHW", "NCHW"),
        precision=lax.Precision.HIGHEST)
    y = y + conv_b.reshape(1, -1, 1, 1)
    ref_f32 = y.reshape(B, E, Np).transpose(0, 2, 1)
    assert jnp.allclose(out, ref_f32, atol=1e-2, rtol=1e-2)

    print("KERNEL_OK")
</pallas_src>

<mosaic_0001>
module attributes {stable_mosaic.version = 11 : i64} {
  func.func @_patch_embed_kernel(%arg0: i32, %arg1: i32, %arg2: memref<1x4x2x4x4x4xf32, #tpu.memory_space<vmem>>, %arg3: memref<64x32xbf16, #tpu.memory_space<vmem>>, %arg4: memref<1x32xf32, #tpu.memory_space<vmem>>, %arg5: memref<1x8x32xf32, #tpu.memory_space<vmem>>, %arg6: memref<8x64xf32, #tpu.memory_space<vmem>>) attributes {dimension_semantics = [#tpu.dimension_semantics<parallel>, #tpu.dimension_semantics<parallel>], iteration_bounds = array<i64: 2, 2>, scalar_prefetch = 0 : i64, scratch_operands = 1 : i64, tpu.core_type = #tpu.core_type<tc>, window_params = [{transform_indices = @transform_0, window_bounds = array<i64: 1, 4, 2, 4, 4, 4>}, {pipeline_mode = #tpu.pipeline_mode<synchronous>, transform_indices = @transform_1, window_bounds = array<i64: 64, 32>}, {pipeline_mode = #tpu.pipeline_mode<synchronous>, transform_indices = @transform_2, window_bounds = array<i64: 1, 32>}, {transform_indices = @transform_3, window_bounds = array<i64: 1, 8, 32>}]} {
    %c0 = arith.constant 0 : index
    %c0_0 = arith.constant 0 : index
    %c0_1 = arith.constant 0 : index
    %c0_2 = arith.constant 0 : index
    %c0_3 = arith.constant 0 : index
    %c0_4 = arith.constant 0 : index
    %0 = vector.load %arg2[%c0, %c0_0, %c0_1, %c0_2, %c0_3, %c0_4] : memref<1x4x2x4x4x4xf32, #tpu.memory_space<vmem>>, vector<1x1x1x1x4x4xf32>
    %1 = vector.shape_cast %0 : vector<1x1x1x1x4x4xf32> to vector<4x4xf32>
    %c0_5 = arith.constant 0 : index
    %c0_6 = arith.constant 0 : index
    %2 = vector.load %arg6[%c0_5, %c0_6] : memref<8x64xf32, #tpu.memory_space<vmem>>, vector<4x4xf32>
    tpu.vector_store %arg6[%c0_5, %c0_6], %1 {strides = array<i32>} : memref<8x64xf32, #tpu.memory_space<vmem>>, vector<4x4xf32>,
    %c0_7 = arith.constant 0 : index
    %c0_8 = arith.constant 0 : index
    %c0_9 = arith.constant 0 : index
    %c1 = arith.constant 1 : index
    %c0_10 = arith.constant 0 : index
    %c0_11 = arith.constant 0 : index
    %3 = vector.load %arg2[%c0_7, %c0_8, %c0_9, %c1, %c0_10, %c0_11] : memref<1x4x2x4x4x4xf32, #tpu.memory_space<vmem>>, vector<1x1x1x1x4x4xf32>
    %4 = vector.shape_cast %3 : vector<1x1x1x1x4x4xf32> to vector<4x4xf32>
    %c0_12 = arith.constant 0 : index
    %c4 = arith.constant 4 : index
    %5 = vector.load %arg6[%c0_12, %c4] : memref<8x64xf32, #tpu.memory_space<vmem>>, vector<4x4xf32>
    tpu.vector_store %arg6[%c0_12, %c4], %4 {strides = array<i32>} : memref<8x64xf32, #tpu.memory_space<vmem>>, vector<4x4xf32>,
    %c0_13 = arith.constant 0 : index
    %c0_14 = arith.constant 0 : index
    %c0_15 = arith.constant 0 : index
    %c2 = arith.constant 2 : index
    %c0_16 = arith.constant 0 : index
    %c0_17 = arith.constant 0 : index
    %6 = vector.load %arg2[%c0_13, %c0_14, %c0_15, %c2, %c0_16, %c0_17] : memref<1x4x2x4x4x4xf32, #tpu.memory_space<vmem>>, vector<1x1x1x1x4x4xf32>
    %7 = vector.shape_cast %6 : vector<1x1x1x1x4x4xf32> to vector<4x4xf32>
    %c0_18 = arith.constant 0 : index
    %c8 = arith.constant 8 : index
    %8 = vector.load %arg6[%c0_18, %c8] : memref<8x64xf32, #tpu.memory_space<vmem>>, vector<4x4xf32>
    tpu.vector_store %arg6[%c0_18, %c8], %7 {strides = array<i32>} : memref<8x64xf32, #tpu.memory_space<vmem>>, vector<4x4xf32>,
    %c0_19 = arith.constant 0 : index
    %c0_20 = arith.constant 0 : index
    %c0_21 = arith.constant 0 : index
    %c3 = arith.constant 3 : index
    %c0_22 = arith.constant 0 : index
    %c0_23 = arith.constant 0 : index
    %9 = vector.load %arg2[%c0_19, %c0_20, %c0_21, %c3, %c0_22, %c0_23] : memref<1x4x2x4x4x4xf32, #tpu.memory_space<vmem>>, vector<1x1x1x1x4x4xf32>
    %10 = vector.shape_cast %9 : vector<1x1x1x1x4x4xf32> to vector<4x4xf32>
    %c0_24 = arith.constant 0 : index
    %c12 = arith.constant 12 : index
    %11 = vector.load %arg6[%c0_24, %c12] : memref<8x64xf32, #tpu.memory_space<vmem>>, vector<4x4xf32>
    tpu.vector_store %arg6[%c0_24, %c12], %10 {strides = array<i32>} : memref<8x64xf32, #tpu.memory_space<vmem>>, vector<4x4xf32>,
    %c0_25 = arith.constant 0 : index
    %c0_26 = arith.constant 0 : index
    %c1_27 = arith.constant 1 : index
    %c0_28 = arith.constant 0 : index
    %c0_29 = arith.constant 0 : index
    %c0_30 = arith.constant 0 : index
    %12 = vector.load %arg2[%c0_25, %c0_26, %c1_27, %c0_28, %c0_29, %c0_30] : memref<1x4x2x4x4x4xf32, #tpu.memory_space<vmem>>, vector<1x1x1x1x4x4xf32>
    %13 = vector.shape_cast %12 : vector<1x1x1x1x4x4xf32> to vector<4x4xf32>
    %c4_31 = arith.constant 4 : index
    %c0_32 = arith.constant 0 : index
    %14 = vector.load %arg6[%c4_31, %c0_32] : memref<8x64xf32, #tpu.memory_space<vmem>>, vector<4x4xf32>
    tpu.vector_store %arg6[%c4_31, %c0_32], %13 {strides = array<i32>} : memref<8x64xf32, #tpu.memory_space<vmem>>, vector<4x4xf32>,
    %c0_33 = arith.constant 0 : index
    %c0_34 = arith.constant 0 : index
    %c1_35 = arith.constant 1 : index
    %c1_36 = arith.constant 1 : index
    %c0_37 = arith.constant 0 : index
    %c0_38 = arith.constant 0 : index
    %15 = vector.load %arg2[%c0_33, %c0_34, %c1_35, %c1_36, %c0_37, %c0_38] : memref<1x4x2x4x4x4xf32, #tpu.memory_space<vmem>>, vector<1x1x1x1x4x4xf32>
    %16 = vector.shape_cast %15 : vector<1x1x1x1x4x4xf32> to vector<4x4xf32>
    %c4_39 = arith.constant 4 : index
    %c4_40 = arith.constant 4 : index
    %17 = vector.load %arg6[%c4_39, %c4_40] : memref<8x64xf32, #tpu.memory_space<vmem>>, vector<4x4xf32>
    tpu.vector_store %arg6[%c4_39, %c4_40], %16 {strides = array<i32>} : memref<8x64xf32, #tpu.memory_space<vmem>>, vector<4x4xf32>,
    %c0_41 = arith.constant 0 : index
    %c0_42 = arith.constant 0 : index
    %c1_43 = arith.constant 1 : index
    %c2_44 = arith.constant 2 : index
    %c0_45 = arith.constant 0 : index
    %c0_46 = arith.constant 0 : index
    %18 = vector.load %arg2[%c0_41, %c0_42, %c1_43, %c2_44, %c0_45, %c0_46] : memref<1x4x2x4x4x4xf32, #tpu.memory_space<vmem>>, vector<1x1x1x1x4x4xf32>
    %19 = vector.shape_cast %18 : vector<1x1x1x1x4x4xf32> to vector<4x4xf32>
    %c4_47 = arith.constant 4 : index
    %c8_48 = arith.constant 8 : index
    %20 = vector.load %arg6[%c4_47, %c8_48] : memref<8x64xf32, #tpu.memory_space<vmem>>, vector<4x4xf32>
    tpu.vector_store %arg6[%c4_47, %c8_48], %19 {strides = array<i32>} : memref<8x64xf32, #tpu.memory_space<vmem>>, vector<4x4xf32>,
    %c0_49 = arith.constant 0 : index
    %c0_50 = arith.constant 0 : index
    %c1_51 = arith.constant 1 : index
    %c3_52 = arith.constant 3 : index
    %c0_53 = arith.constant 0 : index
    %c0_54 = arith.constant 0 : index
    %21 = vector.load %arg2[%c0_49, %c0_50, %c1_51, %c3_52, %c0_53, %c0_54] : memref<1x4x2x4x4x4xf32, #tpu.memory_space<vmem>>, vector<1x1x1x1x4x4xf32>
    %22 = vector.shape_cast %21 : vector<1x1x1x1x4x4xf32> to vector<4x4xf32>
    %c4_55 = arith.constant 4 : index
    %c12_56 = arith.constant 12 : index
    %23 = vector.load %arg6[%c4_55, %c12_56] : memref<8x64xf32, #tpu.memory_space<vmem>>, vector<4x4xf32>
    tpu.vector_store %arg6[%c4_55, %c12_56], %22 {strides = array<i32>} : memref<8x64xf32, #tpu.memory_space<vmem>>, vector<4x4xf32>,
    %c0_57 = arith.constant 0 : index
    %c1_58 = arith.constant 1 : index
    %c0_59 = arith.constant 0 : index
    %c0_60 = arith.constant 0 : index
    %c0_61 = arith.constant 0 : index
    %c0_62 = arith.constant 0 : index
    %24 = vector.load %arg2[%c0_57, %c1_58, %c0_59, %c0_60, %c0_61, %c0_62] : memref<1x4x2x4x4x4xf32, #tpu.memory_space<vmem>>, vector<1x1x1x1x4x4xf32>
    %25 = vector.shape_cast %24 : vector<1x1x1x1x4x4xf32> to vector<4x4xf32>
    %c0_63 = arith.constant 0 : index
    %c16 = arith.constant 16 : index
    %26 = vector.load %arg6[%c0_63, %c16] : memref<8x64xf32, #tpu.memory_space<vmem>>, vector<4x4xf32>
    tpu.vector_store %arg6[%c0_63, %c16], %25 {strides = array<i32>} : memref<8x64xf32, #tpu.memory_space<vmem>>, vector<4x4xf32>,
    %c0_64 = arith.constant 0 : index
    %c1_65 = arith.constant 1 : index
    %c0_66 = arith.constant 0 : index
    %c1_67 = arith.constant 1 : index
    %c0_68 = arith.constant 0 : index
    %c0_69 = arith.constant 0 : index
    %27 = vector.load %arg2[%c0_64, %c1_65, %c0_66, %c1_67, %c0_68, %c0_69] : memref<1x4x2x4x4x4xf32, #tpu.memory_space<vmem>>, vector<1x1x1x1x4x4xf32>
    %28 = vector.shape_cast %27 : vector<1x1x1x1x4x4xf32> to vector<4x4xf32>
    %c0_70 = arith.constant 0 : index
    %c20 = arith.constant 20 : index
    %29 = vector.load %arg6[%c0_70, %c20] : memref<8x64xf32, #tpu.memory_space<vmem>>, vector<4x4xf32>
    tpu.vector_store %arg6[%c0_70, %c20], %28 {strides = array<i32>} : memref<8x64xf32, #tpu.memory_space<vmem>>, vector<4x4xf32>,
    %c0_71 = arith.constant 0 : index
    %c1_72 = arith.constant 1 : index
    %c0_73 = arith.constant 0 : index
    %c2_74 = arith.constant 2 : index
    %c0_75 = arith.constant 0 : index
    %c0_76 = arith.constant 0 : index
    %30 = vector.load %arg2[%c0_71, %c1_72, %c0_73, %c2_74, %c0_75, %c0_76] : memref<1x4x2x4x4x4xf32, #tpu.memory_space<vmem>>, vector<1x1x1x1x4x4xf32>
    %31 = vector.shape_cast %30 : vector<1x1x1x1x4x4xf32> to vector<4x4xf32>
    %c0_77 = arith.constant 0 : index
    %c24 = arith.constant 24 : index
    %32 = vector.load %arg6[%c0_77, %c24] : memref<8x64xf32, #tpu.memory_space<vmem>>, vector<4x4xf32>
    tpu.vector_store %arg6[%c0_77, %c24], %31 {strides = array<i32>} : memref<8x64xf32, #tpu.memory_space<vmem>>, vector<4x4xf32>,
    %c0_78 = arith.constant 0 : index
    %c1_79 = arith.constant 1 : index
    %c0_80 = arith.constant 0 : index
    %c3_81 = arith.constant 3 : index
    %c0_82 = arith.constant 0 : index
    %c0_83 = arith.constant 0 : index
    %33 = vector.load %arg2[%c0_78, %c1_79, %c0_80, %c3_81, %c0_82, %c0_83] : memref<1x4x2x4x4x4xf32, #tpu.memory_space<vmem>>, vector<1x1x1x1x4x4xf32>
    %34 = vector.shape_cast %33 : vector<1x1x1x1x4x4xf32> to vector<4x4xf32>
    %c0_84 = arith.constant 0 : index
    %c28 = arith.constant 28 : index
    %35 = vector.load %arg6[%c0_84, %c28] : memref<8x64xf32, #tpu.memory_space<vmem>>, vector<4x4xf32>
    tpu.vector_store %arg6[%c0_84, %c28], %34 {strides = array<i32>} : memref<8x64xf32, #tpu.memory_space<vmem>>, vector<4x4xf32>,
    %c0_85 = arith.constant 0 : index
    %c1_86 = arith.constant 1 : index
    %c1_87 = arith.constant 1 : index
    %c0_88 = arith.constant 0 : index
    %c0_89 = arith.constant 0 : index
    %c0_90 = arith.constant 0 : index
    %36 = vector.load %arg2[%c0_85, %c1_86, %c1_87, %c0_88, %c0_89, %c0_90] : memref<1x4x2x4x4x4xf32, #tpu.memory_space<vmem>>, vector<1x1x1x1x4x4xf32>
    %37 = vector.shape_cast %36 : vector<1x1x1x1x4x4xf32> to vector<4x4xf32>
    %c4_91 = arith.constant 4 : index
    %c16_92 = arith.constant 16 : index
    %38 = vector.load %arg6[%c4_91, %c16_92] : memref<8x64xf32, #tpu.memory_space<vmem>>, vector<4x4xf32>
    tpu.vector_store %arg6[%c4_91, %c16_92], %37 {strides = array<i32>} : memref<8x64xf32, #tpu.memory_space<vmem>>, vector<4x4xf32>,
    %c0_93 = arith.constant 0 : index
    %c1_94 = arith.constant 1 : index
    %c1_95 = arith.constant 1 : index
    %c1_96 = arith.constant 1 : index
    %c0_97 = arith.constant 0 : index
    %c0_98 = arith.constant 0 : index
    %39 = vector.load %arg2[%c0_93, %c1_94, %c1_95, %c1_96, %c0_97, %c0_98] : memref<1x4x2x4x4x4xf32, #tpu.memory_space<vmem>>, vector<1x1x1x1x4x4xf32>
    %40 = vector.shape_cast %39 : vector<1x1x1x1x4x4xf32> to vector<4x4xf32>
    %c4_99 = arith.constant 4 : index
    %c20_100 = arith.constant 20 : index
    %41 = vector.load %arg6[%c4_99, %c20_100] : memref<8x64xf32, #tpu.memory_space<vmem>>, vector<4x4xf32>
    tpu.vector_store %arg6[%c4_99, %c20_100], %40 {strides = array<i32>} : memref<8x64xf32, #tpu.memory_space<vmem>>, vector<4x4xf32>,
    %c0_101 = arith.constant 0 : index
    %c1_102 = arith.constant 1 : index
    %c1_103 = arith.constant 1 : index
    %c2_104 = arith.constant 2 : index
    %c0_105 = arith.constant 0 : index
    %c0_106 = arith.constant 0 : index
    %42 = vector.load %arg2[%c0_101, %c1_102, %c1_103, %c2_104, %c0_105, %c0_106] : memref<1x4x2x4x4x4xf32, #tpu.memory_space<vmem>>, vector<1x1x1x1x4x4xf32>
    %43 = vector.shape_cast %42 : vector<1x1x1x1x4x4xf32> to vector<4x4xf32>
    %c4_107 = arith.constant 4 : index
    %c24_108 = arith.constant 24 : index
    %44 = vector.load %arg6[%c4_107, %c24_108] : memref<8x64xf32, #tpu.memory_space<vmem>>, vector<4x4xf32>
    tpu.vector_store %arg6[%c4_107, %c24_108], %43 {strides = array<i32>} : memref<8x64xf32, #tpu.memory_space<vmem>>, vector<4x4xf32>,
    %c0_109 = arith.constant 0 : index
    %c1_110 = arith.constant 1 : index
    %c1_111 = arith.constant 1 : index
    %c3_112 = arith.constant 3 : index
    %c0_113 = arith.constant 0 : index
    %c0_114 = arith.constant 0 : index
    %45 = vector.load %arg2[%c0_109, %c1_110, %c1_111, %c3_112, %c0_113, %c0_114] : memref<1x4x2x4x4x4xf32, #tpu.memory_space<vmem>>, vector<1x1x1x1x4x4xf32>
    %46 = vector.shape_cast %45 : vector<1x1x1x1x4x4xf32> to vector<4x4xf32>
    %c4_115 = arith.constant 4 : index
    %c28_116 = arith.constant 28 : index
    %47 = vector.load %arg6[%c4_115, %c28_116] : memref<8x64xf32, #tpu.memory_space<vmem>>, vector<4x4xf32>
    tpu.vector_store %arg6[%c4_115, %c28_116], %46 {strides = array<i32>} : memref<8x64xf32, #tpu.memory_space<vmem>>, vector<4x4xf32>,
    %c0_117 = arith.constant 0 : index
    %c2_118 = arith.constant 2 : index
    %c0_119 = arith.constant 0 : index
    %c0_120 = arith.constant 0 : index
    %c0_121 = arith.constant 0 : index
    %c0_122 = arith.constant 0 : index
    %48 = vector.load %arg2[%c0_117, %c2_118, %c0_119, %c0_120, %c0_121, %c0_122] : memref<1x4x2x4x4x4xf32, #tpu.memory_space<vmem>>, vector<1x1x1x1x4x4xf32>
    %49 = vector.shape_cast %48 : vector<1x1x1x1x4x4xf32> to vector<4x4xf32>
    %c0_123 = arith.constant 0 : index
    %c32 = arith.constant 32 : index
    %50 = vector.load %arg6[%c0_123, %c32] : memref<8x64xf32, #tpu.memory_space<vmem>>, vector<4x4xf32>
    tpu.vector_store %arg6[%c0_123, %c32], %49 {strides = array<i32>} : memref<8x64xf32, #tpu.memory_space<vmem>>, vector<4x4xf32>,
    %c0_124 = arith.constant 0 : index
    %c2_125 = arith.constant 2 : index
    %c0_126 = arith.constant 0 : index
    %c1_127 = arith.constant 1 : index
    %c0_128 = arith.constant 0 : index
    %c0_129 = arith.constant 0 : index
    %51 = vector.load %arg2[%c0_124, %c2_125, %c0_126, %c1_127, %c0_128, %c0_129] : memref<1x4x2x4x4x4xf32, #tpu.memory_space<vmem>>, vector<1x1x1x1x4x4xf32>
    %52 = vector.shape_cast %51 : vector<1x1x1x1x4x4xf32> to vector<4x4xf32>
    %c0_130 = arith.constant 0 : index
    %c36 = arith.constant 36 : index
    %53 = vector.load %arg6[%c0_130, %c36] : memref<8x64xf32, #tpu.memory_space<vmem>>, vector<4x4xf32>
    tpu.vector_store %arg6[%c0_130, %c36], %52 {strides = array<i32>} : memref<8x64xf32, #tpu.memory_space<vmem>>, vector<4x4xf32>,
    %c0_131 = arith.constant 0 : index
    %c2_132 = arith.constant 2 : index
    %c0_133 = arith.constant 0 : index
    %c2_134 = arith.constant 2 : index
    %c0_135 = arith.constant 0 : index
    %c0_136 = arith.constant 0 : index
    %54 = vector.load %arg2[%c0_131, %c2_132, %c0_133, %c2_134, %c0_135, %c0_136] : memref<1x4x2x4x4x4xf32, #tpu.memory_space<vmem>>, vector<1x1x1x1x4x4xf32>
    %55 = vector.shape_cast %54 : vector<1x1x1x1x4x4xf32> to vector<4x4xf32>
    %c0_137 = arith.constant 0 : index
    %c40 = arith.constant 40 : index
    %56 = vector.load %arg6[%c0_137, %c40] : memref<8x64xf32, #tpu.memory_space<vmem>>, vector<4x4xf32>
    tpu.vector_store %arg6[%c0_137, %c40], %55 {strides = array<i32>} : memref<8x64xf32, #tpu.memory_space<vmem>>, vector<4x4xf32>,
    %c0_138 = arith.constant 0 : index
    %c2_139 = arith.constant 2 : index
    %c0_140 = arith.constant 0 : index
    %c3_141 = arith.constant 3 : index
    %c0_142 = arith.constant 0 : index
    %c0_143 = arith.constant 0 : index
    %57 = vector.load %arg2[%c0_138, %c2_139, %c0_140, %c3_141, %c0_142, %c0_143] : memref<1x4x2x4x4x4xf32, #tpu.memory_space<vmem>>, vector<1x1x1x1x4x4xf32>
    %58 = vector.shape_cast %57 : vector<1x1x1x1x4x4xf32> to vector<4x4xf32>
    %c0_144 = arith.constant 0 : index
    %c44 = arith.constant 44 : index
    %59 = vector.load %arg6[%c0_144, %c44] : memref<8x64xf32, #tpu.memory_space<vmem>>, vector<4x4xf32>
    tpu.vector_store %arg6[%c0_144, %c44], %58 {strides = array<i32>} : memref<8x64xf32, #tpu.memory_space<vmem>>, vector<4x4xf32>,
    %c0_145 = arith.constant 0 : index
    %c2_146 = arith.constant 2 : index
    %c1_147 = arith.constant 1 : index
    %c0_148 = arith.constant 0 : index
    %c0_149 = arith.constant 0 : index
    %c0_150 = arith.constant 0 : index
    %60 = vector.load %arg2[%c0_145, %c2_146, %c1_147, %c0_148, %c0_149, %c0_150] : memref<1x4x2x4x4x4xf32, #tpu.memory_space<vmem>>, vector<1x1x1x1x4x4xf32>
    %61 = vector.shape_cast %60 : vector<1x1x1x1x4x4xf32> to vector<4x4xf32>
    %c4_151 = arith.constant 4 : index
    %c32_152 = arith.constant 32 : index
    %62 = vector.load %arg6[%c4_151, %c32_152] : memref<8x64xf32, #tpu.memory_space<vmem>>, vector<4x4xf32>
    tpu.vector_store %arg6[%c4_151, %c32_152], %61 {strides = array<i32>} : memref<8x64xf32, #tpu.memory_space<vmem>>, vector<4x4xf32>,
    %c0_153 = arith.constant 0 : index
    %c2_154 = arith.constant 2 : index
    %c1_155 = arith.constant 1 : index
    %c1_156 = arith.constant 1 : index
    %c0_157 = arith.constant 0 : index
    %c0_158 = arith.constant 0 : index
    %63 = vector.load %arg2[%c0_153, %c2_154, %c1_155, %c1_156, %c0_157, %c0_158] : memref<1x4x2x4x4x4xf32, #tpu.memory_space<vmem>>, vector<1x1x1x1x4x4xf32>
    %64 = vector.shape_cast %63 : vector<1x1x1x1x4x4xf32> to vector<4x4xf32>
    %c4_159 = arith.constant 4 : index
    %c36_160 = arith.constant 36 : index
    %65 = vector.load %arg6[%c4_159, %c36_160] : memref<8x64xf32, #tpu.memory_space<vmem>>, vector<4x4xf32>
    tpu.vector_store %arg6[%c4_159, %c36_160], %64 {strides = array<i32>} : memref<8x64xf32, #tpu.memory_space<vmem>>, vector<4x4xf32>,
    %c0_161 = arith.constant 0 : index
    %c2_162 = arith.constant 2 : index
    %c1_163 = arith.constant 1 : index
    %c2_164 = arith.constant 2 : index
    %c0_165 = arith.constant 0 : index
    %c0_166 = arith.constant 0 : index
    %66 = vector.load %arg2[%c0_161, %c2_162, %c1_163, %c2_164, %c0_165, %c0_166] : memref<1x4x2x4x4x4xf32, #tpu.memory_space<vmem>>, vector<1x1x1x1x4x4xf32>
    %67 = vector.shape_cast %66 : vector<1x1x1x1x4x4xf32> to vector<4x4xf32>
    %c4_167 = arith.constant 4 : index
    %c40_168 = arith.constant 40 : index
    %68 = vector.load %arg6[%c4_167, %c40_168] : memref<8x64xf32, #tpu.memory_space<vmem>>, vector<4x4xf32>
    tpu.vector_store %arg6[%c4_167, %c40_168], %67 {strides = array<i32>} : memref<8x64xf32, #tpu.memory_space<vmem>>, vector<4x4xf32>,
    %c0_169 = arith.constant 0 : index
    %c2_170 = arith.constant 2 : index
    %c1_171 = arith.constant 1 : index
    %c3_172 = arith.constant 3 : index
    %c0_173 = arith.constant 0 : index
    %c0_174 = arith.constant 0 : index
    %69 = vector.load %arg2[%c0_169, %c2_170, %c1_171, %c3_172, %c0_173, %c0_174] : memref<1x4x2x4x4x4xf32, #tpu.memory_space<vmem>>, vector<1x1x1x1x4x4xf32>
    %70 = vector.shape_cast %69 : vector<1x1x1x1x4x4xf32> to vector<4x4xf32>
    %c4_175 = arith.constant 4 : index
    %c44_176 = arith.constant 44 : index
    %71 = vector.load %arg6[%c4_175, %c44_176] : memref<8x64xf32, #tpu.memory_space<vmem>>, vector<4x4xf32>
    tpu.vector_store %arg6[%c4_175, %c44_176], %70 {strides = array<i32>} : memref<8x64xf32, #tpu.memory_space<vmem>>, vector<4x4xf32>,
    %c0_177 = arith.constant 0 : index
    %c3_178 = arith.constant 3 : index
    %c0_179 = arith.constant 0 : index
    %c0_180 = arith.constant 0 : index
    %c0_181 = arith.constant 0 : index
    %c0_182 = arith.constant 0 : index
    %72 = vector.load %arg2[%c0_177, %c3_178, %c0_179, %c0_180, %c0_181, %c0_182] : memref<1x4x2x4x4x4xf32, #tpu.memory_space<vmem>>, vector<1x1x1x1x4x4xf32>
    %73 = vector.shape_cast %72 : vector<1x1x1x1x4x4xf32> to vector<4x4xf32>
    %c0_183 = arith.constant 0 : index
    %c48 = arith.constant 48 : index
    %74 = vector.load %arg6[%c0_183, %c48] : memref<8x64xf32, #tpu.memory_space<vmem>>, vector<4x4xf32>
    tpu.vector_store %arg6[%c0_183, %c48], %73 {strides = array<i32>} : memref<8x64xf32, #tpu.memory_space<vmem>>, vector<4x4xf32>,
    %c0_184 = arith.constant 0 : index
    %c3_185 = arith.constant 3 : index
    %c0_186 = arith.constant 0 : index
    %c1_187 = arith.constant 1 : index
    %c0_188 = arith.constant 0 : index
    %c0_189 = arith.constant 0 : index
    %75 = vector.load %arg2[%c0_184, %c3_185, %c0_186, %c1_187, %c0_188, %c0_189] : memref<1x4x2x4x4x4xf32, #tpu.memory_space<vmem>>, vector<1x1x1x1x4x4xf32>
    %76 = vector.shape_cast %75 : vector<1x1x1x1x4x4xf32> to vector<4x4xf32>
    %c0_190 = arith.constant 0 : index
    %c52 = arith.constant 52 : index
    %77 = vector.load %arg6[%c0_190, %c52] : memref<8x64xf32, #tpu.memory_space<vmem>>, vector<4x4xf32>
    tpu.vector_store %arg6[%c0_190, %c52], %76 {strides = array<i32>} : memref<8x64xf32, #tpu.memory_space<vmem>>, vector<4x4xf32>,
    %c0_191 = arith.constant 0 : index
    %c3_192 = arith.constant 3 : index
    %c0_193 = arith.constant 0 : index
    %c2_194 = arith.constant 2 : index
    %c0_195 = arith.constant 0 : index
    %c0_196 = arith.constant 0 : index
    %78 = vector.load %arg2[%c0_191, %c3_192, %c0_193, %c2_194, %c0_195, %c0_196] : memref<1x4x2x4x4x4xf32, #tpu.memory_space<vmem>>, vector<1x1x1x1x4x4xf32>
    %79 = vector.shape_cast %78 : vector<1x1x1x1x4x4xf32> to vector<4x4xf32>
    %c0_197 = arith.constant 0 : index
    %c56 = arith.constant 56 : index
    %80 = vector.load %arg6[%c0_197, %c56] : memref<8x64xf32, #tpu.memory_space<vmem>>, vector<4x4xf32>
    tpu.vector_store %arg6[%c0_197, %c56], %79 {strides = array<i32>} : memref<8x64xf32, #tpu.memory_space<vmem>>, vector<4x4xf32>,
    %c0_198 = arith.constant 0 : index
    %c3_199 = arith.constant 3 : index
    %c0_200 = arith.constant 0 : index
    %c3_201 = arith.constant 3 : index
    %c0_202 = arith.constant 0 : index
    %c0_203 = arith.constant 0 : index
    %81 = vector.load %arg2[%c0_198, %c3_199, %c0_200, %c3_201, %c0_202, %c0_203] : memref<1x4x2x4x4x4xf32, #tpu.memory_space<vmem>>, vector<1x1x1x1x4x4xf32>
    %82 = vector.shape_cast %81 : vector<1x1x1x1x4x4xf32> to vector<4x4xf32>
    %c0_204 = arith.constant 0 : index
    %c60 = arith.constant 60 : index
    %83 = vector.load %arg6[%c0_204, %c60] : memref<8x64xf32, #tpu.memory_space<vmem>>, vector<4x4xf32>
    tpu.vector_store %arg6[%c0_204, %c60], %82 {strides = array<i32>} : memref<8x64xf32, #tpu.memory_space<vmem>>, vector<4x4xf32>,
    %c0_205 = arith.constant 0 : index
    %c3_206 = arith.constant 3 : index
    %c1_207 = arith.constant 1 : index
    %c0_208 = arith.constant 0 : index
    %c0_209 = arith.constant 0 : index
    %c0_210 = arith.constant 0 : index
    %84 = vector.load %arg2[%c0_205, %c3_206, %c1_207, %c0_208, %c0_209, %c0_210] : memref<1x4x2x4x4x4xf32, #tpu.memory_space<vmem>>, vector<1x1x1x1x4x4xf32>
    %85 = vector.shape_cast %84 : vector<1x1x1x1x4x4xf32> to vector<4x4xf32>
    %c4_211 = arith.constant 4 : index
    %c48_212 = arith.constant 48 : index
    %86 = vector.load %arg6[%c4_211, %c48_212] : memref<8x64xf32, #tpu.memory_space<vmem>>, vector<4x4xf32>
    tpu.vector_store %arg6[%c4_211, %c48_212], %85 {strides = array<i32>} : memref<8x64xf32, #tpu.memory_space<vmem>>, vector<4x4xf32>,
    %c0_213 = arith.constant 0 : index
    %c3_214 = arith.constant 3 : index
    %c1_215 = arith.constant 1 : index
    %c1_216 = arith.constant 1 : index
    %c0_217 = arith.constant 0 : index
    %c0_218 = arith.constant 0 : index
    %87 = vector.load %arg2[%c0_213, %c3_214, %c1_215, %c1_216, %c0_217, %c0_218] : memref<1x4x2x4x4x4xf32, #tpu.memory_space<vmem>>, vector<1x1x1x1x4x4xf32>
    %88 = vector.shape_cast %87 : vector<1x1x1x1x4x4xf32> to vector<4x4xf32>
    %c4_219 = arith.constant 4 : index
    %c52_220 = arith.constant 52 : index
    %89 = vector.load %arg6[%c4_219, %c52_220] : memref<8x64xf32, #tpu.memory_space<vmem>>, vector<4x4xf32>
    tpu.vector_store %arg6[%c4_219, %c52_220], %88 {strides = array<i32>} : memref<8x64xf32, #tpu.memory_space<vmem>>, vector<4x4xf32>,
    %c0_221 = arith.constant 0 : index
    %c3_222 = arith.constant 3 : index
    %c1_223 = arith.constant 1 : index
    %c2_224 = arith.constant 2 : index
    %c0_225 = arith.constant 0 : index
    %c0_226 = arith.constant 0 : index
    %90 = vector.load %arg2[%c0_221, %c3_222, %c1_223, %c2_224, %c0_225, %c0_226] : memref<1x4x2x4x4x4xf32, #tpu.memory_space<vmem>>, vector<1x1x1x1x4x4xf32>
    %91 = vector.shape_cast %90 : vector<1x1x1x1x4x4xf32> to vector<4x4xf32>
    %c4_227 = arith.constant 4 : index
    %c56_228 = arith.constant 56 : index
    %92 = vector.load %arg6[%c4_227, %c56_228] : memref<8x64xf32, #tpu.memory_space<vmem>>, vector<4x4xf32>
    tpu.vector_store %arg6[%c4_227, %c56_228], %91 {strides = array<i32>} : memref<8x64xf32, #tpu.memory_space<vmem>>, vector<4x4xf32>,
    %c0_229 = arith.constant 0 : index
    %c3_230 = arith.constant 3 : index
    %c1_231 = arith.constant 1 : index
    %c3_232 = arith.constant 3 : index
    %c0_233 = arith.constant 0 : index
    %c0_234 = arith.constant 0 : index
    %93 = vector.load %arg2[%c0_229, %c3_230, %c1_231, %c3_232, %c0_233, %c0_234] : memref<1x4x2x4x4x4xf32, #tpu.memory_space<vmem>>, vector<1x1x1x1x4x4xf32>
    %94 = vector.shape_cast %93 : vector<1x1x1x1x4x4xf32> to vector<4x4xf32>
    %c4_235 = arith.constant 4 : index
    %c60_236 = arith.constant 60 : index
    %95 = vector.load %arg6[%c4_235, %c60_236] : memref<8x64xf32, #tpu.memory_space<vmem>>, vector<4x4xf32>
    tpu.vector_store %arg6[%c4_235, %c60_236], %94 {strides = array<i32>} : memref<8x64xf32, #tpu.memory_space<vmem>>, vector<4x4xf32>,
    %c0_237 = arith.constant 0 : index
    %c0_238 = arith.constant 0 : index
    %96 = vector.load %arg6[%c0_237, %c0_238] : memref<8x64xf32, #tpu.memory_space<vmem>>, vector<8x64xf32>
    %97 = arith.truncf %96 : vector<8x64xf32> to vector<8x64xbf16>
    %c0_239 = arith.constant 0 : index
    %c0_240 = arith.constant 0 : index
    %98 = vector.load %arg3[%c0_239, %c0_240] : memref<64x32xbf16, #tpu.memory_space<vmem>>, vector<64x32xbf16>
    %cst = arith.constant dense<0.000000e+00> : vector<8x32xf32>
    %99 = tpu.matmul %97, %98, %cst {dimension_numbers = #tpu.dot_dimension_numbers<[1], [0], [0], [1], [0, 0, 1, 1], [], []>} : vector<8x64xbf16>, vector<64x32xbf16>, vector<8x32xf32> -> vector<8x32xf32>
    %c0_241 = arith.constant 0 : index
    %c0_242 = arith.constant 0 : index
    %100 = vector.load %arg4[%c0_241, %c0_242] : memref<1x32xf32, #tpu.memory_space<vmem>>, vector<1x32xf32>
    %101 = vector.broadcast %100 : vector<1x32xf32> to vector<8x32xf32>
    %102 = arith.addf %99, %101 : vector<8x32xf32>
    %c0_243 = arith.constant 0 : index
    %c0_244 = arith.constant 0 : index
    %c0_245 = arith.constant 0 : index
    %103 = vector.load %arg5[%c0_243, %c0_244, %c0_245] : memref<1x8x32xf32, #tpu.memory_space<vmem>>, vector<1x8x32xf32>
    %104 = vector.shape_cast %103 : vector<1x8x32xf32> to vector<8x32xf32>
    %105 = vector.shape_cast %102 : vector<8x32xf32> to vector<1x8x32xf32>
    tpu.vector_store %arg5[%c0_243, %c0_244, %c0_245], %105 {strides = array<i32>} : memref<1x8x32xf32, #tpu.memory_space<vmem>>, vector<1x8x32xf32>,
    return
  }
  func.func @transform_0(%arg0: i32, %arg1: i32) -> (i32, i32, i32, i32, i32, i32) {
    %c0_i32 = arith.constant 0 : i32
    %c0_i32_0 = arith.constant 0 : i32
    %c0_i32_1 = arith.constant 0 : i32
    %c0_i32_2 = arith.constant 0 : i32
    %c0_i32_3 = arith.constant 0 : i32
    return %arg0, %c0_i32, %arg1, %c0_i32_0, %c0_i32_1, %c0_i32_2 : i32, i32, i32, i32, i32, i32
  }
  func.func @transform_1(%arg0: i32, %arg1: i32) -> (i32, i32) {
    %c0_i32 = arith.constant 0 : i32
    %c0_i32_0 = arith.constant 0 : i32
    %c0_i32_1 = arith.constant 0 : i32
    return %c0_i32, %c0_i32_0 : i32, i32
  }
  func.func @transform_2(%arg0: i32, %arg1: i32) -> (i32, i32) {
    %c0_i32 = arith.constant 0 : i32
    %c0_i32_0 = arith.constant 0 : i32
    %c0_i32_1 = arith.constant 0 : i32
    return %c0_i32, %c0_i32_0 : i32, i32
  }
  func.func @transform_3(%arg0: i32, %arg1: i32) -> (i32, i32, i32) {
    %c0_i32 = arith.constant 0 : i32
    %c0_i32_0 = arith.constant 0 : i32
    return %arg0, %arg1, %c0_i32 : i32, i32, i32
  }
}

</mosaic_0001>

<bundles_post_ra>
// kernel: tpu_custom_call.1
= control target key start
LH: loop header
LB: loop body
LE: loop exit
PB: predicated region body
PF: predicated region fallthrough
CT: control target
= control target key end

     0   :  { %8 = vsyncpa [#allocation4], 0  ;;  %s1201_s0 = inlined_call_operand.hbm [shape: f32[2,4,4,4,4,4], index: 0, kind: input, shape index: {}]   ;;  %s1202_s1 = inlined_call_operand.vmem [shape: bf16[64,32], index: 1, kind: input, shape index: {}]   ;;  %s1203_s2 = inlined_call_operand.vmem [shape: f32[1,32], index: 2, kind: input, shape index: {}]   ;;  %s1204_s3 = inlined_call_operand.hbm [shape: f32[2,16,32], index: 3, kind: output, shape index: {}]  }
   0x1   :  { %10 = vsyncpa [#allocation4 + $0x1], 0 }
   0x2   :  { %11 = vsyncpa [#allocation5], 0 }
   0x3   :  { %13 = vsyncpa [#allocation5 + $0x1], 0  ;;  %s980_s12 = smov 0   ;;  %s982_s13 = smov 0  }
   0x4   :  { %s984_s14 = smov 0   ;;  %s986_s15 = smov 0  }
   0x5   :  { %s988_s16 = smov 0   ;;  %s990_s17 = smov 0  }
   0x6   :  { %s992_s18 = smov 0   ;;  %s994_s19 = smov 0  }
   0x7 LB: > { %s655_s20 = sadd.s32 4294967295, %s934_s19   ;;  %s656_s21 = sadd.s32 4294967294, %s934_s19   ;;  %s934_s19 = sphi %s994_s19, %s19_s19   ;;  %s930_s18 = sphi %s992_s18, %s1221_s18   ;;  %s926_s17 = sphi %s990_s17, %s1220_s17   ;;  %s922_s16 = sphi %s988_s16, %s1219_s16   ;;  %s918_s15 = sphi %s986_s15, %s1218_s15   ;;  %s914_s14 = sphi %s984_s14, %s1217_s14   ;;  %s910_s13 = sphi %s982_s13, %s1216_s13   ;;  %s906_s12 = sphi %s980_s12, %s1215_s12  }
   0x8   : > { %s28_s22 = sadd.s32 1, %s926_s17  ;;  %s31_s23 = sadd.s32 1, %s930_s18 }
   0x9   : > { %p29_p0 = scmp.ge.s32.totalorder %s28_s22, 2  ;;  %p47_p1 = scmp.ne.s32.totalorder %s914_s14, %s910_s13 }
   0xa   : > { %p48_p2 = scmp.eq.s32.totalorder %s934_s19, 0  ;;  %p53_p5 = scmp.ne.s32.totalorder %s910_s13, %s906_s12 }
   0xb   : > { %s1223_s22 = smov (%p29_p0, %s28_s22), 0  ;;  %s1225_s23 = smov (!%p29_p0, %s31_s23), %s930_s18 }
   0xc   : > { %1207 = sst [smem:[#allocation12_spill]] %s1223_s22  ;;  %s36_s24 = ssub.s32 %s926_s17, %s1223_s22 }
   0xd   : > { %p1032_p3 = por %p48_p2, %p47_p1  ;;  %p33_p4 = scmp.ge.s32.totalorder %s1225_s23, 2 }
   0xe   : > { %p54_p6 = scmp.eq.s32.totalorder %s655_s20, 0  ;;  %p121_p7 = scmp.eq.s32.totalorder %s655_s20, 3 }
   0xf   : > { %s1227_s23 = smov (%p33_p4, %s1225_s23), 0  ;;  %p127_p10 = scmp.eq.s32.totalorder %s656_s21, 3 }
  0x10   : > { %1209 = sst [smem:[#allocation13_spill]] %s1227_s23  ;;  %p1040_p8 = por %p54_p6, %p53_p5 }
  0x11   : > { %p1044_p9 = por %p121_p7, %p47_p1  ;;  %s35_s28 = ssub.s32 %s930_s18, %s1227_s23 }
  0x12   : > { %s37_s29 = sor.u32 %s36_s24, %s35_s28  ;;  %s40_s30 = sadd.s32 1, %s914_s14 }
  0x13   : > { %p38_p11 = scmp.eq.s32.totalorder %s37_s29, 0  ;;  %p1051_p12 = por %p127_p10, %p53_p5 }
  0x14   : > { %p658_p13 = scmp.ge.s32.totalorder %s934_s19, 4 }
  0x15   : > { %s1056_s5 = scalar_select %p38_p11, %s914_s14, %s40_s30  }
  0x16   : > { %149 = sbr.rel (%p658_p13) target bundleno = 45 (0x2d), region = 24 }
  0x1d   : > { %s153_s6 = sand.u32 1, %s914_s14   ;;  %s711_s7 = sshll.u32 %s926_s17, 3 }
  0x1e   : > { %s659_s8 = sshll.u32 %s153_s6, 7  ;;  %s662_s9 = sshll.u32 %s930_s18, 6 }
  0x1f   : > { %s164_s10 = sadd.s32 %s711_s7, %s662_s9  ;;  %s157_s11 = scalar_lea.vmem [#allocation3], %s659_s8 }
  0x20   : > { %s179_s20 = sshll.u32 %s157_s11, 4  ;;  %s663_s21 = sshll.u32 %s164_s10, 6  ;;  %s180_s20 = int_to_ptr.vmem [resolvable:$true] %s179_s20 }
  0x21   : > { %s729_s24 = scalar_select %p1032_p3, [#allocation0], [#allocation9] }
  0x22   : > { %s936_s28 = smov 1024   ;;  %s937_s30 = smov 512  }
  0x23   : > { %730 = sst [smem:[#allocation8]] (%p1032_p3), %s936_s28  ;;  %s938_s23 = smov 8  }
  0x24   : > { %s171_s29 = sld [smem:[%s729_s24]]   ;;  %s939_s7 = smov 64  }
  0x25   : > { %731 = sst [smem:[#allocation8 + $0x1]] (%p1032_p3), %s937_s30  ;;  %s166_s10 = scalar_lea.hbm %s1201_s0, %s663_s21 }
  0x26   : > { %732 = sst [smem:[#allocation8 + $0x2]] (%p1032_p3), %s938_s23  ;;  %s940_s11 = smov 4  }
  0x27   : > { %733 = sst [smem:[#allocation8 + $0x3]] (%p1032_p3), %s939_s7  ;;  %s154_s22 = scalar_lea.sflag [#allocation4], %s153_s6 }
  0x28   : > { %734 = sst [smem:[#allocation8 + $0x4]] (%p1032_p3), %s939_s7  ;;  %s941_s30 = smov [#allocation7]  }
  0x29   : > { %735 = sst [smem:[#allocation8 + $0x5]] (%p1032_p3), %s940_s11 }
  0x2a   : > { %s664_s24 = sshll.u32 %s171_s29, 26 }
  0x2b   : > { %s665_s28 = sadd.s32 134217728, %s664_s24 }
  0x2c   : > { %736 = dma.general (%p1032_p3), %s166_s10, 2048, %s180_s20, %s154_s22, %s941_s30, [#allocation8], %s665_s28, 0  }
  0x2d PF: > { %p666_p0 = scmp.ge.s32.totalorder %s934_s19, 1  ;;  %p200_p1 = scmp.lt.s32.totalorder %s934_s19, 5 }
  0x2f   : > { %p201_p2 = pnand %p666_p0, %p200_p1 }
  0x30   : > { %s1084_s23 = sand.u32 (!%p201_p2), 1, %s910_s13  }
  0x31   : > { %204 = sbr.rel (%p201_p2) target bundleno = 468 (0x1d4), region = 32  ;;  %s667_s21 = sshll.u32 (!%p201_p2), %s1084_s23, 7 }
  0x32   : > { %s207_s29 = scalar_lea.sflag (!%p201_p2), [#allocation4], %s1084_s23  ;;  %s1088_s7 = scalar_lea.vmem (!%p201_p2), [#allocation3], %s667_s21 }
  0x38   : > { %897 = dma.done.wait (%p1040_p8), %s207_s29, 2048  }
  0x39   : > { %899 = vsyncadd (%p1040_p8), %s207_s29, 4294965248  ;;  %v670_v0 = vld [vmem:[%s1088_s7 + $0x8] sm:$0xf]  ;;  %v669_v1 = vld [vmem:[%s1088_s7 + $0x4] sm:$0xf]  ;;  %s942_s22 = smov 8  }
  0x3a   : > { %249 = vrot.lane.b32.xlu1 %v670_v0, %s942_s22  ;;  %s943_s25 = smov 4   ;;  %v674_v2 = vld [vmem:[%s1088_s7 + $0x18] sm:$0xf]  ;;  %v673_v3 = vld [vmem:[%s1088_s7 + $0x14] sm:$0xf]  ;;  %s944_s26 = smov 12  }
  0x3b   : > { %241 = vrot.lane.b32.xlu0 %v669_v1, %s943_s25  ;;  %v675_v4 = vld [vmem:[%s1088_s7 + $0x1c] sm:$0xf]  ;;  %v671_v5 = vld [vmem:[%s1088_s7 + $0xc] sm:$0xf]  ;;  %vm236_vm0 = vcmask 27648   ;;  %s945_s6 = smov 16  }
  0x3c   : > { %v680_v6 = vld [vmem:[%s1088_s7 + $0x30] sm:$0xf]  ;;  %v676_v7 = vld [vmem:[%s1088_s7 + $0x20] sm:$0xf]  ;;  %v681_v10 = vld [vmem:[%s1088_s7 + $0x34] sm:$0xf] }
  0x3d   : > { %v235_v8 = vld [vmem:[%s1088_s7] sm:$0xf]  ;;  %v672_v9 = vld [vmem:[%s1088_s7 + $0x10] sm:$0xf]  ;;  %v677_v11 = vld [vmem:[%s1088_s7 + $0x24] sm:$0xf] }
  0x3e   : > { %275 = vrot.lane.b32.xlu1 %v674_v2, %s942_s22  ;;  %237 = vst.msk [vmem:[#allocation2] sm:$0xf] %vm236_vm0, %v235_v8  ;;  %264 = vst.msk [vmem:[#allocation2 + $0x4] sm:$0xf] %vm236_vm0, %v672_v9  ;;  %s946_s20 = smov 20   ;;  %s947_s8 = smov 24  }
  0x3f   : > { %268 = vrot.lane.b32.xlu0 %v673_v3, %s943_s25  ;;  %v682_v12 = vld [vmem:[%s1088_s7 + $0x38] sm:$0xf]  ;;  %v678_v13 = vld [vmem:[%s1088_s7 + $0x28] sm:$0xf]  ;;  %v683_v14 = vld [vmem:[%s1088_s7 + $0x3c] sm:$0xf] }
  0x40   : > { %v679_v15 = vld [vmem:[%s1088_s7 + $0x2c] sm:$0xf]  ;;  %s948_s9 = smov 28   ;;  %v688_v16 = vld [vmem:[%s1088_s7 + $0x50] sm:$0xf]  ;;  %s949_s10 = smov 32  }
  0x41   : > { %v684_v17 = vld [vmem:[%s1088_s7 + $0x40] sm:$0xf]  ;;  %v689_v18 = vld [vmem:[%s1088_s7 + $0x54] sm:$0xf]  ;;  %v685_v19 = vld [vmem:[%s1088_s7 + $0x44] sm:$0xf] }
  0x42   : > { %282 = vrot.lane.b32.xlu1 %v675_v4, %s944_s26  ;;  %s950_s11 = smov 36   ;;  %v690_v20 = vld [vmem:[%s1088_s7 + $0x58] sm:$0xf]  ;;  %v686_v21 = vld [vmem:[%s1088_s7 + $0x48] sm:$0xf]  ;;  %s951_s30 = smov 40  }
  0x43   : > { %257 = vrot.lane.b32.xlu0 %v671_v5, %s944_s26  ;;  %v832_v22 = vld [vmem:[%s1202_s1] sm:$0xff]   ;;  %v687_v24 = vld [vmem:[%s1088_s7 + $0x4c] sm:$0xf]  ;;  %v952_v25 = vmov 0.0   ;;  %v833_v26 = vld [vmem:[%s1202_s1 + $0x8] sm:$0xff]   ;;  %s953_s22 = smov 44  }
  0x44   : > { %v691_v23 = vld [vmem:[%s1088_s7 + $0x5c] sm:$0xf]  ;;  %717 = vmatprep.subr.bf16.mxu0 %v952_v25  ;;  %v696_v27 = vld [vmem:[%s1088_s7 + $0x70] sm:$0xf]  ;;  %v692_v28 = vld [vmem:[%s1088_s7 + $0x60] sm:$0xf] }
  0x45   : > { %718 = vmatpush3.bf16.msra.mxu0 %v832_v22  ;;  %v834_v29 = vld [vmem:[%s1202_s1 + $0x10] sm:$0xff]   ;;  %v697_v30 = vld [vmem:[%s1088_s7 + $0x74] sm:$0xf]  ;;  %v693_v31 = vld [vmem:[%s1088_s7 + $0x64] sm:$0xf]  ;;  %vm955_vm1 = vmmov 0  }
  0x46   : > { %321 = vrot.lane.b32.xlu1 %v680_v6, %s945_s6  ;;  %719 = vmatprep.subr.bf16.mxu0 %v952_v25  ;;  %v835_v32 = vld [vmem:[%s1202_s1 + $0x18] sm:$0xff]   ;;  %v698_v33 = vld [vmem:[%s1088_s7 + $0x78] sm:$0xf]  ;;  %v694_v34 = vld [vmem:[%s1088_s7 + $0x68] sm:$0xf]  ;;  %vm244_vm2 = vcmask 60448  }
  0x47   : > { %289 = vrot.lane.b32.xlu0 %v676_v7, %s945_s6  ;;  %s954_s6 = smov 48   ;;  %725 = vmatprep.mubr.msk.bf16.mxu0 %vm955_vm1, %v952_v25  ;;  %v699_v35 = vld [vmem:[%s1088_s7 + $0x7c] sm:$0xf]  ;;  %v695_v36 = vld [vmem:[%s1088_s7 + $0x6c] sm:$0xf]  ;;  %vm252_vm3 = vcmask 93248  }
  0x48   : > { %vm260_vm4 = vcmask 126048   ;;  %vm292_vm5 = vcmask 158848   ;;  %vm300_vm6 = vcmask 191648   ;;  %vm308_vm7 = vcmask 224448   ;;  %s668_s7 = sshll.u32 %s1084_s23, 3  ;;  %s707_s24 = sshll.u32 %s922_s16, 1 }
  0x49   : > { %720 = vmatpush3.bf16.msra.mxu0 %v833_v26  ;;  %vm316_vm8 = vcmask 257248   ;;  %vm352_vm9 = vcmask 290048   ;;  %vm360_vm10 = vcmask 322848   ;;  %vm368_vm11 = vcmask 355648   ;;  %s565_s28 = sadd.s32 %s918_s15, %s707_s24  ;;  %v700_v5 = vld [vmem:[%s1203_s2] ss:$0 sm:$0xff] }
  0x4a   : > { %328 = vrot.lane.b32.xlu1 %v681_v10, %s946_s20  ;;  %721 = vmatprep.subr.bf16.mxu0 %v952_v25  ;;  %vm376_vm12 = vcmask 388448   ;;  %vm412_vm13 = vcmask 421248   ;;  %vm420_vm14 = vcmask 454048   ;;  %vm428_vm15 = vcmask 486848   ;;  %s708_s29 = sshll.u32 %s565_s28, 7  ;;  %s554_s15 = scalar_lea.sflag [#allocation5], %s1084_s23 }
  0x4b   : > { %297 = vrot.lane.b32.xlu0 %v677_v11, %s946_s20  ;;  %vm436_vm0 = vcmask 519648   ;;  %vm507_vm1 = vcmask 523264   ;;  %s1147_s20 = scalar_lea.hbm %s1204_s3, %s708_s29 }
  0x4d   : > { %722 = vmatpush3.bf16.msra.mxu0 %v834_v29 }
  0x4e   : > { %335 = vrot.lane.b32.xlu1 %v682_v12, %s947_s8  ;;  %723 = vmatprep.subr.bf16.mxu0 %v952_v25 }
  0x4f   : > { %305 = vrot.lane.b32.xlu0 %v678_v13, %s947_s8  ;;  %s959_s8 = smov [#allocation6]  }
  0x51   : > { %724 = vmatpush3.bf16.msra.mxu0 %v835_v32 }
  0x52   : > { %342 = vrot.lane.b32.xlu1 %v683_v14, %s948_s9 }
  0x53   : > { %313 = vrot.lane.b32.xlu0 %v679_v15, %s948_s9  ;;  %s956_s9 = smov 52  }
  0x56   : > { %381 = vrot.lane.b32.xlu1 %v688_v16, %s949_s10 }
  0x57   : > { %349 = vrot.lane.b32.xlu0 %v684_v17, %s949_s10  ;;  %s957_s10 = smov 56  }
  0x5a   : > { %388 = vrot.lane.b32.xlu1 %v689_v18, %s950_s11 }
  0x5b   : > { %357 = vrot.lane.b32.xlu0 %v685_v19, %s950_s11  ;;  %s958_s11 = smov 60  }
  0x5e   : > { %395 = vrot.lane.b32.xlu1 %v690_v20, %s951_s30 }
  0x5f   : > { %365 = vrot.lane.b32.xlu0 %v686_v21, %s951_s30 }
  0x62   : > { %402 = vrot.lane.b32.xlu1 %v691_v23, %s953_s22 }
  0x63   : > { %373 = vrot.lane.b32.xlu0 %v687_v24, %s953_s22  ;;  %s232_s22 = scalar_lea.vmem [#allocation6], %s668_s7 }
  0x64   : > { %s569_s25 = sshll.u32 %s232_s22, 4  ;;  %s1149_s25 = int_to_ptr.vmem [resolvable:$true] %s569_s25 }
  0x65   : > { %s836_s16 = scalar_lea.vmem %s1149_s25, 128 }
  0x66   : > { %441 = vrot.lane.b32.xlu1 %v696_v27, %s954_s6  ;;  %p837_p3 = scmp.ne.s32.totalorder %s1149_s25, %s836_s16 }
  0x67   : > { %409 = vrot.lane.b32.xlu0 %v692_v28, %s954_s6 }
  0x68   : > { %p838_p4 = pnand %p837_p3, %p1044_p9 }
  0x6a   : > { %448 = vrot.lane.b32.xlu1 %v697_v30, %s956_s9  ;;  %p839_p5 = pneg %p838_p4 }
  0x6b   : > { %417 = vrot.lane.b32.xlu0 %v693_v31, %s956_s9  ;;  %s840_s9 = sshll.u32 %s959_s8, 4  ;;  %s841_s9 = int_to_ptr.vmem [resolvable:$false] %s840_s9 }
  0x6c   : > { %p843_p6 = scmp.lt.s32.totalorder %s1149_s25, %s841_s9 }
  0x6e   : > { %455 = vrot.lane.b32.xlu1 %v698_v33, %s957_s10 }
  0x6f   : > { %425 = vrot.lane.b32.xlu0 %v694_v34, %s957_s10  ;;  %s842_s10 = scalar_lea.vmem %s841_s9, 256 }
  0x70   : > { %p844_p7 = scmp.lt.s32.totalorder %s842_s10, %s836_s16 }
  0x72   : > { %462 = vrot.lane.b32.xlu1 %v699_v35, %s958_s11  ;;  %p845_p8 = por %p844_p7, %p843_p6 }
  0x73   : > { %433 = vrot.lane.b32.xlu0 %v695_v36, %s958_s11 }
  0x74   : > { %p846_p10 = pnand %p845_p8, %p839_p5 }
  0xac   : > { %v250_v37 = vpop.permute.xlu1 %249 }
  0xad   : > { %v242_v38 = vpop.permute.xlu0 %241 }
  0xae   : > { %245 = vst.msk [vmem:[#allocation2] sm:$0xf] %vm244_vm2, %v242_v38 }
  0xaf   : > { %253 = vst.msk [vmem:[#allocation2] sm:$0xf] %vm252_vm3, %v250_v37 }
  0xb0   : > { %v276_v39 = vpop.permute.xlu1 %275 }
  0xb1   : > { %v269_v40 = vpop.permute.xlu0 %268 }
  0xb2   : > { %271 = vst.msk [vmem:[#allocation2 + $0x4] sm:$0xf] %vm244_vm2, %v269_v40  ;;  %vm551_vm2 = vcmask 261120  }
  0xb3   : > { %278 = vst.msk [vmem:[#allocation2 + $0x4] sm:$0xf] %vm252_vm3, %v276_v39 }
  0xb4   : > { %v283_v41 = vpop.permute.xlu1 %282 }
  0xb5   : > { %v258_v42 = vpop.permute.xlu0 %257  ;;  %285 = vst.msk [vmem:[#allocation2 + $0x4] sm:$0xf] %vm260_vm4, %v283_v41 }
  0xb6   : > { %261 = vst.msk [vmem:[#allocation2] sm:$0xf] %vm260_vm4, %v258_v42 }
  0xb8   : > { %v322_v43 = vpop.permute.xlu1 %321 }
  0xb9   : > { %v290_v44 = vpop.permute.xlu0 %289  ;;  %324 = vst.msk [vmem:[#allocation2 + $0x4] sm:$0xf] %vm292_vm5, %v322_v43 }
  0xba   : > { %293 = vst.msk [vmem:[#allocation2] sm:$0xf] %vm292_vm5, %v290_v44 }
  0xbc   : > { %v329_v45 = vpop.permute.xlu1 %328 }
  0xbd   : > { %v298_v46 = vpop.permute.xlu0 %297  ;;  %331 = vst.msk [vmem:[#allocation2 + $0x4] sm:$0xf] %vm300_vm6, %v329_v45 }
  0xbe   : > { %301 = vst.msk [vmem:[#allocation2] sm:$0xf] %vm300_vm6, %v298_v46 }
  0xc0   : > { %v336_v47 = vpop.permute.xlu1 %335 }
  0xc1   : > { %v306_v48 = vpop.permute.xlu0 %305  ;;  %338 = vst.msk [vmem:[#allocation2 + $0x4] sm:$0xf] %vm308_vm7, %v336_v47 }
  0xc2   : > { %309 = vst.msk [vmem:[#allocation2] sm:$0xf] %vm308_vm7, %v306_v48 }
  0xc4   : > { %v343_v49 = vpop.permute.xlu1 %342 }
  0xc5   : > { %v314_v50 = vpop.permute.xlu0 %313  ;;  %345 = vst.msk [vmem:[#allocation2 + $0x4] sm:$0xf] %vm316_vm8, %v343_v49 }
  0xc6   : > { %317 = vst.msk [vmem:[#allocation2] sm:$0xf] %vm316_vm8, %v314_v50 }
  0xc8   : > { %v382_v51 = vpop.permute.xlu1 %381 }
  0xc9   : > { %v350_v52 = vpop.permute.xlu0 %349  ;;  %384 = vst.msk [vmem:[#allocation2 + $0x4] sm:$0xf] %vm352_vm9, %v382_v51 }
  0xca   : > { %353 = vst.msk [vmem:[#allocation2] sm:$0xf] %vm352_vm9, %v350_v52 }
  0xcc   : > { %v389_v53 = vpop.permute.xlu1 %388 }
  0xcd   : > { %v358_v54 = vpop.permute.xlu0 %357  ;;  %391 = vst.msk [vmem:[#allocation2 + $0x4] sm:$0xf] %vm360_vm10, %v389_v53 }
  0xce   : > { %361 = vst.msk [vmem:[#allocation2] sm:$0xf] %vm360_vm10, %v358_v54 }
  0xd0   : > { %v396_v55 = vpop.permute.xlu1 %395 }
  0xd1   : > { %v366_v56 = vpop.permute.xlu0 %365  ;;  %398 = vst.msk [vmem:[#allocation2 + $0x4] sm:$0xf] %vm368_vm11, %v396_v55 }
  0xd2   : > { %369 = vst.msk [vmem:[#allocation2] sm:$0xf] %vm368_vm11, %v366_v56 }
  0xd4   : > { %v403_v57 = vpop.permute.xlu1 %402 }
  0xd5   : > { %v374_v58 = vpop.permute.xlu0 %373  ;;  %405 = vst.msk [vmem:[#allocation2 + $0x4] sm:$0xf] %vm376_vm12, %v403_v57 }
  0xd6   : > { %377 = vst.msk [vmem:[#allocation2] sm:$0xf] %vm376_vm12, %v374_v58 }
  0xd8   : > { %v442_v59 = vpop.permute.xlu1 %441 }
  0xd9   : > { %v410_v60 = vpop.permute.xlu0 %409  ;;  %444 = vst.msk [vmem:[#allocation2 + $0x4] sm:$0xf] %vm412_vm13, %v442_v59 }
  0xda   : > { %413 = vst.msk [vmem:[#allocation2] sm:$0xf] %vm412_vm13, %v410_v60 }
  0xdc   : > { %v449_v61 = vpop.permute.xlu1 %448 }
  0xdd   : > { %v418_v62 = vpop.permute.xlu0 %417  ;;  %451 = vst.msk [vmem:[#allocation2 + $0x4] sm:$0xf] %vm420_vm14, %v449_v61 }
  0xde   : > { %421 = vst.msk [vmem:[#allocation2] sm:$0xf] %vm420_vm14, %v418_v62 }
  0xe0   : > { %v456_v63 = vpop.permute.xlu1 %455 }
  0xe1   : > { %v426_v0 = vpop.permute.xlu0 %425  ;;  %458 = vst.msk [vmem:[#allocation2 + $0x4] sm:$0xf] %vm428_vm15, %v456_v63 }
  0xe2   : > { %429 = vst.msk [vmem:[#allocation2] sm:$0xf] %vm428_vm15, %v426_v0 }
  0xe4   : > { %v463_v1 = vpop.permute.xlu1 %462 }
  0xe5   : > { %v434_v2 = vpop.permute.xlu0 %433  ;;  %465 = vst.msk [vmem:[#allocation2 + $0x4] sm:$0xf] %vm436_vm0, %v463_v1 }
  0xe6   : > { %437 = vst.msk [vmem:[#allocation2] sm:$0xf] %vm436_vm0, %v434_v2 }
  0xed   : > { %v466_v3 = vld [vmem:[#allocation2] sm:$0xff] }
  0xee   : > { %v467_v4 = vpack.c.bf16 %v466_v3, %v466_v3 }
  0xf0   : > { %726 = vmatmul.mubr.msk.bf16.vlgmr.msra.gmra.mrb[0].mxu0 %vm507_vm1, %v467_v4 }
 0x1c3   : > { %v545_v6 = vpop.f32.mrb[0].mxu0 }
 0x1c4   : > { %v546_v7 = vadd.f32 %v700_v5, %v545_v6  ;;  %v727_v8 = vpop.f32.mrb[1].mxu0 }
 0x1c5   : > { %v548_v9 = vpop.f32.mrb[2].mxu0 }
 0x1c6   : > { %v728_v10 = vpop.f32.mrb[3].mxu0  ;;  %552 = vst.msk [vmem:[%s232_s22] sm:$0xff] %vm551_vm2, %v546_v7 }
 0x1c7   : > { %849 = shalt.err (!%p846_p10)
}
 0x1c8   : > { %s850_s23 = scalar_lea.hbm %s1147_s20, 128  ;;  %s854_s24 = scalar_lea.hbm %s1204_s3, 512 }
 0x1c9   : > { %p851_p11 = scmp.ne.s32.totalorder %s1147_s20, %s850_s23  ;;  %p855_p1 = scmp.lt.u32.totalorder %s1147_s20, %s1204_s3 }
 0x1ca   : > { %p856_p2 = scmp.lt.u32.totalorder %s854_s24, %s850_s23  ;;  %p858_p4 = scmp.lt.u32.totalorder %s850_s23, %s1147_s20 }
 0x1cb   : > { %p852_p13 = pnand %p851_p11, %p1044_p9 }
 0x1cc   : > { %p857_p3 = por %p856_p2, %p855_p1 }
 0x1cd   : > { %p853_p0 = pneg %p852_p13 }
 0x1ce   : > { %p859_p5 = por %p858_p4, %p857_p3 }
 0x1d0   : > { %p860_p6 = pnand %p859_p5, %p853_p0 }
 0x1d2   : > { %863 = shalt.err (!%p860_p6)
}
 0x1d3   : > { %738 = dma.vmem_to_hbm [thread:$0]  (%p1044_p9), %s1149_s25, 128, %s1147_s20, %s554_s15  }
 0x1d4 PF: > { %p744_p7 = scmp.ge.s32.totalorder %s934_s19, 2  ;;  %s581_s21 = sand.u32 1, %s906_s12  }
 0x1d5   : > { %s582_s29 = scalar_lea.sflag [#allocation5], %s581_s21 }
 0x1d6   : > { %p741_p8 = pnand %p744_p7, %p1051_p12 }
 0x1d8   : > { %901 = dma.done.wait (!%p741_p8), %s582_s29, 128  }
 0x1d9   : > { %903 = vsyncadd (!%p741_p8), %s582_s29, 4294967168  ;;  %s19_s19 = sadd.s32 1, %s934_s19   ;;  %s1213_s27 = sld [smem:[#allocation12_spill]] }
 0x1da   : > { %p16_p10 = scmp.ge.s32.totalorder %s19_s19, 6   ;;  %s1214_s22 = sld [smem:[#allocation13_spill]] }
 0x1db   : > { %s1215_s12 = smov %s910_s13  ;;  %s1216_s13 = smov %s914_s14 }
 0x1dc   : > { %s1217_s14 = smov %s1056_s5  ;;  %s1218_s15 = smov %s926_s17 }
 0x1dd   : > { %s1219_s16 = smov %s930_s18  ;;  %18 = sbr.rel (!%p16_p10) target bundleno = 7 (0x7), region = 113 }
 0x1df   : > { %s1220_s17 = smov %s1213_s27 }
 0x1e0   : > { %s1221_s18 = smov %s1214_s22 }
 0x1e4   :  { %587 = vsyncpa [#allocation4], 1 }
 0x1e5   :  { %589 = vsyncpa [#allocation4 + $0x1], 1 }
 0x1e6   :  { %590 = vsyncpa [#allocation5], 1 }
 0x1e7   :  { %592 = vsyncpa [#allocation5 + $0x1], 1 }

</bundles_post_ra>
